<compile_context>
chip_gen: v5e
topology: v5e:2x2
jax: 0.10.0
libtpu: 0.0.40
codegen_flags: <defaults>
</compile_context>

<pallas_src>
import jax
import jax.numpy as jnp
from jax.experimental import pallas as pl
from jax.experimental.pallas import tpu as pltpu


def _postprocess_kernel(obj_logits_ref,    # VMEM (Bt, Q, C)   object class logits
                        verb_logits_ref,   # VMEM (Bt, Q, V)   verb logits
                        inter_ref,         # VMEM (Bt, Q, 1)   interactiveness logits
                        geom_ref,          # VMEM (Bt, 8, Q)   [scx,scy,sw,sh,ocx,ocy,ow,oh]
                        scale_ref,         # VMEM (Bt, 2, 1)   [img_w, img_h]
                        obj_scores_ref,    # VMEM (Bt, 1, Q)   f32  (lane-dense)
                        obj_labels_ref,    # VMEM (Bt, 1, Q)   i32  (lane-dense)
                        verb_scores_ref,   # VMEM (Bt, Q, V)   f32
                        boxes_ref):        # VMEM (Bt, 8, Q)   f32 [sub x0 y0 x1 y1 | obj x0 y0 x1 y1]
    logits = obj_logits_ref[...].astype(jnp.float32)            # (Bt, Q, C)
    Bt, Q, C = logits.shape

    # ---- object scores / labels ------------------------------------------
    # softmax over all C classes; max/argmax over the first C-1 classes
    # ("no-object" dropped).  softmax is monotone so max/argmax are taken on
    # the raw logits; the full (Q, C) probability tensor is never formed.
    m_all = jnp.max(logits, axis=-1, keepdims=True)             # (Bt, Q, 1)
    denom = jnp.sum(jnp.exp(logits - m_all), axis=-1, keepdims=True)

    fg = logits[..., :C - 1]                                    # (Bt, Q, C-1)
    max_logit = jnp.max(fg, axis=-1, keepdims=True)             # (Bt, Q, 1)
    obj_score = jnp.exp(max_logit - m_all) / denom              # (Bt, Q, 1)

    col = jax.lax.broadcasted_iota(jnp.int32, fg.shape, 2)
    idx = jnp.where(fg == max_logit, col, C - 1)
    obj_label = jnp.min(idx, axis=-1, keepdims=True)            # first argmax (torch semantics)

    # Lane-dense stores: relayout (Bt, Q, 1) -> (Bt, 1, Q) with a one-hot
    # select + sublane reduction (plain VPU/XLU primitives; avoids depending
    # on transpose/reshape relayouts).  Q is small so the (Bt,Q,Q) temp is tiny.
    src_q = jax.lax.broadcasted_iota(jnp.int32, (Bt, Q, Q), 1)
    dst_q = jax.lax.broadcasted_iota(jnp.int32, (Bt, Q, Q), 2)
    onehot = (src_q == dst_q).astype(jnp.float32)               # (Bt, Q, Q)
    obj_scores_ref[...] = jnp.sum(onehot * obj_score, axis=1, keepdims=True)
    obj_labels_ref[...] = jnp.sum(onehot * obj_label.astype(jnp.float32),
                                  axis=1, keepdims=True).astype(jnp.int32)

    # ---- verb scores = sigmoid(verb) * sigmoid(interactiveness) * obj_score
    vsig = jax.nn.sigmoid(verb_logits_ref[...].astype(jnp.float32))   # (Bt, Q, V)
    isig = jax.nn.sigmoid(inter_ref[...].astype(jnp.float32))         # (Bt, Q, 1)
    verb_scores_ref[...] = vsig * isig * obj_score

    # ---- boxes: cxcywh -> xyxy, scaled by [w, h] per coordinate pair ------
    sub_c = geom_ref[:, 0:2, :].astype(jnp.float32)             # (Bt, 2, Q) [scx, scy]
    sub_wh = geom_ref[:, 2:4, :].astype(jnp.float32)            # (Bt, 2, Q) [sw , sh ]
    obj_c = geom_ref[:, 4:6, :].astype(jnp.float32)
    obj_wh = geom_ref[:, 6:8, :].astype(jnp.float32)
    scale_xy = scale_ref[...].astype(jnp.float32)               # (Bt, 2, 1) [w, h]
    boxes_ref[:, 0:2, :] = (sub_c - 0.5 * sub_wh) * scale_xy    # sub x0, y0
    boxes_ref[:, 2:4, :] = (sub_c + 0.5 * sub_wh) * scale_xy    # sub x1, y1
    boxes_ref[:, 4:6, :] = (obj_c - 0.5 * obj_wh) * scale_xy    # obj x0, y0
    boxes_ref[:, 6:8, :] = (obj_c + 0.5 * obj_wh) * scale_xy    # obj x1, y1


def _pick_block_batch(B, Q, C, V):
    """Block batch size: >=2 grid steps when B >= 2 (v7x megacore), VMEM-capped."""
    if B <= 1:
        return 1
    bt = pl.cdiv(B, 2)
    # Worst-case f32 block bytes per image (inputs + outputs), double-buffered.
    per_img = 4 * (Q * C + Q * V + Q + 8 * Q + 2        # inputs
                   + 2 * Q + Q * V + 8 * Q)             # outputs
    budget = 24 * 1024 * 1024                           # headroom vs 32 MiB scoped VMEM (v7x-safe)
    max_bt = max(1, budget // (2 * per_img))
    return int(min(bt, max_bt))


def postprocess_hoi_pallas(interactiveness, obj_logits, verb_logits,
                           sub_boxes, obj_boxes, target_sizes):
    B, Q, C = obj_logits.shape
    V = verb_logits.shape[-1]

    # ---- wrapper-side layout plumbing only (native dtypes, no duplication) ----
    inter = interactiveness.reshape(B, Q, 1)
    # (B, 8, Q) rows = [scx, scy, sw, sh, ocx, ocy, ow, oh]
    geom = jnp.transpose(jnp.concatenate([sub_boxes, obj_boxes], axis=-1), (0, 2, 1))
    ts = target_sizes.astype(jnp.float32)                       # rows = [h, w]
    scale = jnp.stack([ts[:, 1], ts[:, 0]], axis=1)[:, :, None]  # (B, 2, 1) = [w, h]

    Bt = _pick_block_batch(B, Q, C, V)
    grid = (pl.cdiv(B, Bt),)

    grid_spec = pltpu.PrefetchScalarGridSpec(
        num_scalar_prefetch=0,
        grid=grid,
        in_specs=[
            pl.BlockSpec((Bt, Q, C), lambda g: (g, 0, 0)),       # obj logits
            pl.BlockSpec((Bt, Q, V), lambda g: (g, 0, 0)),       # verb logits
            pl.BlockSpec((Bt, Q, 1), lambda g: (g, 0, 0)),       # interactiveness
            pl.BlockSpec((Bt, 8, Q), lambda g: (g, 0, 0)),       # box geometry (lane-dense)
            pl.BlockSpec((Bt, 2, 1), lambda g: (g, 0, 0)),       # per-image [w, h]
        ],
        out_specs=[
            pl.BlockSpec((Bt, 1, Q), lambda g: (g, 0, 0)),       # obj scores (lane-dense)
            pl.BlockSpec((Bt, 1, Q), lambda g: (g, 0, 0)),       # obj labels (lane-dense)
            pl.BlockSpec((Bt, Q, V), lambda g: (g, 0, 0)),       # verb scores
            pl.BlockSpec((Bt, 8, Q), lambda g: (g, 0, 0)),       # boxes xyxy (lane-dense)
        ],
    )
    out_shape = (
        jax.ShapeDtypeStruct((B, 1, Q), jnp.float32),
        jax.ShapeDtypeStruct((B, 1, Q), jnp.int32),
        jax.ShapeDtypeStruct((B, Q, V), jnp.float32),
        jax.ShapeDtypeStruct((B, 8, Q), jnp.float32),
    )
    fn = pl.pallas_call(
        _postprocess_kernel,
        grid_spec=grid_spec,
        out_shape=out_shape,
        compiler_params=pltpu.CompilerParams(
            dimension_semantics=("parallel",)),
    )
    obj_scores, obj_labels, verb_scores, boxes_all = fn(
        obj_logits, verb_logits, inter, geom, scale)
    return obj_scores[:, 0, :], obj_labels[:, 0, :], verb_scores, boxes_all


class PostProcessHOI:
    """JAX/Pallas port of models/hoi.py::PostProcessHOI (no learnable params)."""

    def __init__(self, subject_category_id):
        self.subject_category_id = subject_category_id

    def __call__(self, outputs, target_sizes):
        assert outputs['pred_obj_logits'].shape[0] == target_sizes.shape[0]
        assert target_sizes.shape[1] == 2

        _, obj_labels, verb_scores, boxes_all = postprocess_hoi_pallas(
            outputs['pred_interactiveness'],
            outputs['pred_obj_logits'],
            outputs['pred_verb_logits'],
            outputs['pred_sub_boxes'],
            outputs['pred_obj_boxes'],
            target_sizes,
        )
        B, _, Q = boxes_all.shape
        # Batched assembly: one transpose + a couple of concatenates for the
        # whole batch (instead of ~2B tiny per-image ops).
        boxes_bq = jnp.transpose(boxes_all, (0, 2, 1))                       # (B, Q, 8)
        boxes_cat = jnp.concatenate([boxes_bq[:, :, 0:4],
                                     boxes_bq[:, :, 4:8]], axis=1)           # (B, 2Q, 4)
        subj = jnp.full((B, Q), self.subject_category_id, dtype=obj_labels.dtype)
        labels_cat = jnp.concatenate([subj, obj_labels], axis=1)             # (B, 2Q)
        ids = jnp.arange(2 * Q, dtype=jnp.int32)

        # TODO(synk): torch reference returns int64 labels and moves tensors to
        # CPU; labels stay int32 and arrays stay on device here.
        results = []
        for i in range(B):
            results.append({
                'labels': labels_cat[i],
                'boxes': boxes_cat[i],
                'verb_scores': verb_scores[i],   # already scaled by obj score in-kernel
                'sub_ids': ids[:Q],
                'obj_ids': ids[Q:],
            })
        return results


if __name__ == "__main__":
    key = jax.random.PRNGKey(0)
    B, Q, C, V = 2, 16, 12, 20   # batch, queries, obj classes (incl. no-object), verbs
    k1, k2, k3, k4, k5 = jax.random.split(key, 5)
    outputs = {
        'pred_interactiveness': jax.random.normal(k1, (B, Q, 1), jnp.float32),
        'pred_obj_logits':      jax.random.normal(k2, (B, Q, C), jnp.float32),
        'pred_verb_logits':     jax.random.normal(k3, (B, Q, V), jnp.float32),
        'pred_sub_boxes':       jax.nn.sigmoid(jax.random.normal(k4, (B, Q, 4), jnp.float32)),
        'pred_obj_boxes':       jax.nn.sigmoid(jax.random.normal(k5, (B, Q, 4), jnp.float32)),
    }
    target_sizes = jnp.array([[480.0, 640.0], [512.0, 768.0]], dtype=jnp.float32)

    postprocessor = PostProcessHOI(subject_category_id=0)
    results = postprocessor(outputs, target_sizes)
    for r in results:
        for v in r.values():
            jax.block_until_ready(v)

    # ---- pure-JAX reference check (mirrors the torch module) ----
    prob = jax.nn.softmax(outputs['pred_obj_logits'], axis=-1)
    ref_scores = prob[..., :-1].max(-1)
    ref_labels = jnp.argmax(prob[..., :-1], axis=-1)
    ref_verbs = (jax.nn.sigmoid(outputs['pred_verb_logits'])
                 * jax.nn.sigmoid(outputs['pred_interactiveness'])
                 * ref_scores[..., None])
    h, w = target_sizes[:, 0], target_sizes[:, 1]
    sf = jnp.stack([w, h, w, h], axis=1)[:, None, :]

    def to_xyxy(b):
        cx, cy, bw, bh = b[..., 0], b[..., 1], b[..., 2], b[..., 3]
        return jnp.stack([cx - 0.5 * bw, cy - 0.5 * bh,
                          cx + 0.5 * bw, cy + 0.5 * bh], axis=-1)

    ref_sub = to_xyxy(outputs['pred_sub_boxes']) * sf
    ref_obj = to_xyxy(outputs['pred_obj_boxes']) * sf

    for i in range(B):
        r = results[i]
        assert float(jnp.max(jnp.abs(r['verb_scores'] - ref_verbs[i]))) < 1e-5
        assert float(jnp.max(jnp.abs(r['boxes'][:Q] - ref_sub[i]))) < 1e-3
        assert float(jnp.max(jnp.abs(r['boxes'][Q:] - ref_obj[i]))) < 1e-3
        assert bool(jnp.all(r['labels'][Q:] == ref_labels[i]))
        assert bool(jnp.all(r['labels'][:Q] == 0))

    print("KERNEL_OK")
</pallas_src>

<mosaic_0001>
module attributes {stable_mosaic.version = 11 : i64} {
  func.func @_postprocess_kernel(%arg0: i32, %arg1: memref<1x16x12xf32, #tpu.memory_space<vmem>>, %arg2: memref<1x16x20xf32, #tpu.memory_space<vmem>>, %arg3: memref<1x16x1xf32, #tpu.memory_space<vmem>>, %arg4: memref<1x8x16xf32, #tpu.memory_space<vmem>>, %arg5: memref<1x2x1xf32, #tpu.memory_space<vmem>>, %arg6: memref<1x1x16xf32, #tpu.memory_space<vmem>>, %arg7: memref<1x1x16xi32, #tpu.memory_space<vmem>>, %arg8: memref<1x16x20xf32, #tpu.memory_space<vmem>>, %arg9: memref<1x8x16xf32, #tpu.memory_space<vmem>>) attributes {dimension_semantics = [#tpu.dimension_semantics<parallel>], iteration_bounds = array<i64: 2>, scalar_prefetch = 0 : i64, scratch_operands = 0 : i64, tpu.core_type = #tpu.core_type<tc>, window_params = [{transform_indices = @transform_0, window_bounds = array<i64: 1, 16, 12>}, {transform_indices = @transform_1, window_bounds = array<i64: 1, 16, 20>}, {transform_indices = @transform_2, window_bounds = array<i64: 1, 16, 1>}, {transform_indices = @transform_3, window_bounds = array<i64: 1, 8, 16>}, {transform_indices = @transform_4, window_bounds = array<i64: 1, 2, 1>}, {transform_indices = @transform_5, window_bounds = array<i64: 1, 1, 16>}, {transform_indices = @transform_6, window_bounds = array<i64: 1, 1, 16>}, {transform_indices = @transform_7, window_bounds = array<i64: 1, 16, 20>}, {transform_indices = @transform_8, window_bounds = array<i64: 1, 8, 16>}]} {
    %c0 = arith.constant 0 : index
    %c0_0 = arith.constant 0 : index
    %c0_1 = arith.constant 0 : index
    %0 = vector.load %arg1[%c0, %c0_0, %c0_1] : memref<1x16x12xf32, #tpu.memory_space<vmem>>, vector<1x16x12xf32>
    %cst = arith.constant dense<0xFF800000> : vector<1x16xf32>
    %1 = vector.multi_reduction <maximumf>, %0, %cst [2] : vector<1x16x12xf32> to vector<1x16xf32>
    %2 = vector.shape_cast %1 : vector<1x16xf32> to vector<1x16x1xf32>
    %3 = vector.broadcast %2 : vector<1x16x1xf32> to vector<1x16x12xf32>
    %4 = arith.subf %0, %3 : vector<1x16x12xf32>
    %5 = math.exp %4 : vector<1x16x12xf32>
    %cst_2 = arith.constant dense<0.000000e+00> : vector<1x16xf32>
    %6 = vector.multi_reduction <add>, %5, %cst_2 [2] : vector<1x16x12xf32> to vector<1x16xf32>
    %7 = vector.shape_cast %6 : vector<1x16xf32> to vector<1x16x1xf32>
    %8 = vector.extract_strided_slice %0 {offsets = [0, 0, 0], sizes = [1, 16, 11], strides = [1, 1, 1]} : vector<1x16x12xf32> to vector<1x16x11xf32>
    %cst_3 = arith.constant dense<0xFF800000> : vector<1x16xf32>
    %9 = vector.multi_reduction <maximumf>, %8, %cst_3 [2] : vector<1x16x11xf32> to vector<1x16xf32>
    %10 = vector.shape_cast %9 : vector<1x16xf32> to vector<1x16x1xf32>
    %11 = arith.subf %10, %2 : vector<1x16x1xf32>
    %12 = math.exp %11 : vector<1x16x1xf32>
    %13 = arith.divf %12, %7 : vector<1x16x1xf32>
    %14 = tpu.iota {dimensions = array<i32: 2>} : vector<1x16x11xi32>
    %15 = vector.broadcast %10 : vector<1x16x1xf32> to vector<1x16x11xf32>
    %16 = arith.cmpf oeq, %8, %15 : vector<1x16x11xf32>
    %c11_i32 = arith.constant 11 : i32
    %17 = vector.broadcast %c11_i32 : i32 to vector<1x16x11xi32>
    %18 = arith.select %16, %14, %17 : vector<1x16x11xi1>, vector<1x16x11xi32>
    %cst_4 = arith.constant dense<2147483647> : vector<1x16xi32>
    %19 = vector.multi_reduction <minsi>, %18, %cst_4 [2] : vector<1x16x11xi32> to vector<1x16xi32>
    %20 = vector.shape_cast %19 : vector<1x16xi32> to vector<1x16x1xi32>
    %21 = tpu.iota {dimensions = array<i32: 1>} : vector<1x16x16xi32>
    %22 = tpu.iota {dimensions = array<i32: 2>} : vector<1x16x16xi32>
    %23 = arith.cmpi eq, %21, %22 : vector<1x16x16xi32>
    %24 = arith.extui %23 : vector<1x16x16xi1> to vector<1x16x16xi32>
    %25 = arith.sitofp %24 : vector<1x16x16xi32> to vector<1x16x16xf32>
    %26 = vector.broadcast %13 : vector<1x16x1xf32> to vector<1x16x16xf32>
    %27 = arith.mulf %25, %26 : vector<1x16x16xf32>
    %cst_5 = arith.constant dense<0.000000e+00> : vector<1x16xf32>
    %28 = vector.multi_reduction <add>, %27, %cst_5 [1] : vector<1x16x16xf32> to vector<1x16xf32>
    %29 = vector.shape_cast %28 : vector<1x16xf32> to vector<1x1x16xf32>
    %c0_6 = arith.constant 0 : index
    %c0_7 = arith.constant 0 : index
    %c0_8 = arith.constant 0 : index
    %30 = vector.load %arg6[%c0_6, %c0_7, %c0_8] : memref<1x1x16xf32, #tpu.memory_space<vmem>>, vector<1x1x16xf32>
    tpu.vector_store %arg6[%c0_6, %c0_7, %c0_8], %29 {strides = array<i32>} : memref<1x1x16xf32, #tpu.memory_space<vmem>>, vector<1x1x16xf32>,
    %31 = arith.sitofp %20 : vector<1x16x1xi32> to vector<1x16x1xf32>
    %32 = vector.broadcast %31 : vector<1x16x1xf32> to vector<1x16x16xf32>
    %33 = arith.mulf %25, %32 : vector<1x16x16xf32>
    %cst_9 = arith.constant dense<0.000000e+00> : vector<1x16xf32>
    %34 = vector.multi_reduction <add>, %33, %cst_9 [1] : vector<1x16x16xf32> to vector<1x16xf32>
    %35 = vector.shape_cast %34 : vector<1x16xf32> to vector<1x1x16xf32>
    %36 = arith.fptosi %35 : vector<1x1x16xf32> to vector<1x1x16xi32>
    %c0_10 = arith.constant 0 : index
    %c0_11 = arith.constant 0 : index
    %c0_12 = arith.constant 0 : index
    %37 = vector.load %arg7[%c0_10, %c0_11, %c0_12] : memref<1x1x16xi32, #tpu.memory_space<vmem>>, vector<1x1x16xi32>
    tpu.vector_store %arg7[%c0_10, %c0_11, %c0_12], %36 {strides = array<i32>} : memref<1x1x16xi32, #tpu.memory_space<vmem>>, vector<1x1x16xi32>,
    %c0_13 = arith.constant 0 : index
    %c0_14 = arith.constant 0 : index
    %c0_15 = arith.constant 0 : index
    %38 = vector.load %arg2[%c0_13, %c0_14, %c0_15] : memref<1x16x20xf32, #tpu.memory_space<vmem>>, vector<1x16x20xf32>
    %39 = arith.negf %38 : vector<1x16x20xf32>
    %40 = math.exp %39 : vector<1x16x20xf32>
    %cst_16 = arith.constant 1.000000e+00 : f32
    %41 = vector.broadcast %cst_16 : f32 to vector<1x16x20xf32>
    %42 = arith.addf %41, %40 : vector<1x16x20xf32>
    %43 = arith.divf %41, %42 : vector<1x16x20xf32>
    %c0_17 = arith.constant 0 : index
    %c0_18 = arith.constant 0 : index
    %c0_19 = arith.constant 0 : index
    %44 = vector.load %arg3[%c0_17, %c0_18, %c0_19] : memref<1x16x1xf32, #tpu.memory_space<vmem>>, vector<1x16x1xf32>
    %45 = arith.negf %44 : vector<1x16x1xf32>
    %46 = math.exp %45 : vector<1x16x1xf32>
    %cst_20 = arith.constant 1.000000e+00 : f32
    %47 = vector.broadcast %cst_20 : f32 to vector<1x16x1xf32>
    %48 = arith.addf %47, %46 : vector<1x16x1xf32>
    %49 = arith.divf %47, %48 : vector<1x16x1xf32>
    %50 = vector.broadcast %49 : vector<1x16x1xf32> to vector<1x16x20xf32>
    %51 = arith.mulf %43, %50 : vector<1x16x20xf32>
    %52 = vector.broadcast %13 : vector<1x16x1xf32> to vector<1x16x20xf32>
    %53 = arith.mulf %51, %52 : vector<1x16x20xf32>
    %c0_21 = arith.constant 0 : index
    %c0_22 = arith.constant 0 : index
    %c0_23 = arith.constant 0 : index
    %54 = vector.load %arg8[%c0_21, %c0_22, %c0_23] : memref<1x16x20xf32, #tpu.memory_space<vmem>>, vector<1x16x20xf32>
    tpu.vector_store %arg8[%c0_21, %c0_22, %c0_23], %53 {strides = array<i32>} : memref<1x16x20xf32, #tpu.memory_space<vmem>>, vector<1x16x20xf32>,
    %c0_24 = arith.constant 0 : index
    %c0_25 = arith.constant 0 : index
    %c0_26 = arith.constant 0 : index
    %55 = vector.load %arg4[%c0_24, %c0_25, %c0_26] : memref<1x8x16xf32, #tpu.memory_space<vmem>>, vector<1x2x16xf32>
    %c0_27 = arith.constant 0 : index
    %c2 = arith.constant 2 : index
    %c0_28 = arith.constant 0 : index
    %56 = vector.load %arg4[%c0_27, %c2, %c0_28] : memref<1x8x16xf32, #tpu.memory_space<vmem>>, vector<1x2x16xf32>
    %c0_29 = arith.constant 0 : index
    %c4 = arith.constant 4 : index
    %c0_30 = arith.constant 0 : index
    %57 = vector.load %arg4[%c0_29, %c4, %c0_30] : memref<1x8x16xf32, #tpu.memory_space<vmem>>, vector<1x2x16xf32>
    %c0_31 = arith.constant 0 : index
    %c6 = arith.constant 6 : index
    %c0_32 = arith.constant 0 : index
    %58 = vector.load %arg4[%c0_31, %c6, %c0_32] : memref<1x8x16xf32, #tpu.memory_space<vmem>>, vector<1x2x16xf32>
    %c0_33 = arith.constant 0 : index
    %c0_34 = arith.constant 0 : index
    %c0_35 = arith.constant 0 : index
    %59 = vector.load %arg5[%c0_33, %c0_34, %c0_35] : memref<1x2x1xf32, #tpu.memory_space<vmem>>, vector<1x2x1xf32>
    %cst_36 = arith.constant 5.000000e-01 : f32
    %60 = vector.broadcast %cst_36 : f32 to vector<1x2x16xf32>
    %61 = arith.mulf %60, %56 : vector<1x2x16xf32>
    %62 = arith.subf %55, %61 : vector<1x2x16xf32>
    %63 = vector.broadcast %59 : vector<1x2x1xf32> to vector<1x2x16xf32>
    %64 = arith.mulf %62, %63 : vector<1x2x16xf32>
    %c0_37 = arith.constant 0 : index
    %c0_38 = arith.constant 0 : index
    %c0_39 = arith.constant 0 : index
    %65 = vector.load %arg9[%c0_37, %c0_38, %c0_39] : memref<1x8x16xf32, #tpu.memory_space<vmem>>, vector<1x2x16xf32>
    tpu.vector_store %arg9[%c0_37, %c0_38, %c0_39], %64 {strides = array<i32>} : memref<1x8x16xf32, #tpu.memory_space<vmem>>, vector<1x2x16xf32>,
    %cst_40 = arith.constant 5.000000e-01 : f32
    %66 = vector.broadcast %cst_40 : f32 to vector<1x2x16xf32>
    %67 = arith.mulf %66, %56 : vector<1x2x16xf32>
    %68 = arith.addf %55, %67 : vector<1x2x16xf32>
    %69 = vector.broadcast %59 : vector<1x2x1xf32> to vector<1x2x16xf32>
    %70 = arith.mulf %68, %69 : vector<1x2x16xf32>
    %c0_41 = arith.constant 0 : index
    %c2_42 = arith.constant 2 : index
    %c0_43 = arith.constant 0 : index
    %71 = vector.load %arg9[%c0_41, %c2_42, %c0_43] : memref<1x8x16xf32, #tpu.memory_space<vmem>>, vector<1x2x16xf32>
    tpu.vector_store %arg9[%c0_41, %c2_42, %c0_43], %70 {strides = array<i32>} : memref<1x8x16xf32, #tpu.memory_space<vmem>>, vector<1x2x16xf32>,
    %cst_44 = arith.constant 5.000000e-01 : f32
    %72 = vector.broadcast %cst_44 : f32 to vector<1x2x16xf32>
    %73 = arith.mulf %72, %58 : vector<1x2x16xf32>
    %74 = arith.subf %57, %73 : vector<1x2x16xf32>
    %75 = vector.broadcast %59 : vector<1x2x1xf32> to vector<1x2x16xf32>
    %76 = arith.mulf %74, %75 : vector<1x2x16xf32>
    %c0_45 = arith.constant 0 : index
    %c4_46 = arith.constant 4 : index
    %c0_47 = arith.constant 0 : index
    %77 = vector.load %arg9[%c0_45, %c4_46, %c0_47] : memref<1x8x16xf32, #tpu.memory_space<vmem>>, vector<1x2x16xf32>
    tpu.vector_store %arg9[%c0_45, %c4_46, %c0_47], %76 {strides = array<i32>} : memref<1x8x16xf32, #tpu.memory_space<vmem>>, vector<1x2x16xf32>,
    %cst_48 = arith.constant 5.000000e-01 : f32
    %78 = vector.broadcast %cst_48 : f32 to vector<1x2x16xf32>
    %79 = arith.mulf %78, %58 : vector<1x2x16xf32>
    %80 = arith.addf %57, %79 : vector<1x2x16xf32>
    %81 = vector.broadcast %59 : vector<1x2x1xf32> to vector<1x2x16xf32>
    %82 = arith.mulf %80, %81 : vector<1x2x16xf32>
    %c0_49 = arith.constant 0 : index
    %c6_50 = arith.constant 6 : index
    %c0_51 = arith.constant 0 : index
    %83 = vector.load %arg9[%c0_49, %c6_50, %c0_51] : memref<1x8x16xf32, #tpu.memory_space<vmem>>, vector<1x2x16xf32>
    tpu.vector_store %arg9[%c0_49, %c6_50, %c0_51], %82 {strides = array<i32>} : memref<1x8x16xf32, #tpu.memory_space<vmem>>, vector<1x2x16xf32>,
    return
  }
  func.func @transform_0(%arg0: i32) -> (i32, i32, i32) {
    %c0_i32 = arith.constant 0 : i32
    %c0_i32_0 = arith.constant 0 : i32
    %c0_i32_1 = arith.constant 0 : i32
    return %arg0, %c0_i32, %c0_i32_0 : i32, i32, i32
  }
  func.func @transform_1(%arg0: i32) -> (i32, i32, i32) {
    %c0_i32 = arith.constant 0 : i32
    %c0_i32_0 = arith.constant 0 : i32
    %c0_i32_1 = arith.constant 0 : i32
    return %arg0, %c0_i32, %c0_i32_0 : i32, i32, i32
  }
  func.func @transform_2(%arg0: i32) -> (i32, i32, i32) {
    %c0_i32 = arith.constant 0 : i32
    %c0_i32_0 = arith.constant 0 : i32
    %c0_i32_1 = arith.constant 0 : i32
    return %arg0, %c0_i32, %c0_i32_0 : i32, i32, i32
  }
  func.func @transform_3(%arg0: i32) -> (i32, i32, i32) {
    %c0_i32 = arith.constant 0 : i32
    %c0_i32_0 = arith.constant 0 : i32
    %c0_i32_1 = arith.constant 0 : i32
    return %arg0, %c0_i32, %c0_i32_0 : i32, i32, i32
  }
  func.func @transform_4(%arg0: i32) -> (i32, i32, i32) {
    %c0_i32 = arith.constant 0 : i32
    %c0_i32_0 = arith.constant 0 : i32
    %c0_i32_1 = arith.constant 0 : i32
    return %arg0, %c0_i32, %c0_i32_0 : i32, i32, i32
  }
  func.func @transform_5(%arg0: i32) -> (i32, i32, i32) {
    %c0_i32 = arith.constant 0 : i32
    %c0_i32_0 = arith.constant 0 : i32
    %c0_i32_1 = arith.constant 0 : i32
    return %arg0, %c0_i32, %c0_i32_0 : i32, i32, i32
  }
  func.func @transform_6(%arg0: i32) -> (i32, i32, i32) {
    %c0_i32 = arith.constant 0 : i32
    %c0_i32_0 = arith.constant 0 : i32
    %c0_i32_1 = arith.constant 0 : i32
    return %arg0, %c0_i32, %c0_i32_0 : i32, i32, i32
  }
  func.func @transform_7(%arg0: i32) -> (i32, i32, i32) {
    %c0_i32 = arith.constant 0 : i32
    %c0_i32_0 = arith.constant 0 : i32
    %c0_i32_1 = arith.constant 0 : i32
    return %arg0, %c0_i32, %c0_i32_0 : i32, i32, i32
  }
  func.func @transform_8(%arg0: i32) -> (i32, i32, i32) {
    %c0_i32 = arith.constant 0 : i32
    %c0_i32_0 = arith.constant 0 : i32
    %c0_i32_1 = arith.constant 0 : i32
    return %arg0, %c0_i32, %c0_i32_0 : i32, i32, i32
  }
}

</mosaic_0001>

<bundles_post_ra>
// kernel: tpu_custom_call.1
= control target key start
LH: loop header
LB: loop body
LE: loop exit
PB: predicated region body
PF: predicated region fallthrough
CT: control target
= control target key end

     0   :  { %s1561_s0 = inlined_call_operand.vmem [shape: f32[2,16,12], index: 0, kind: input, shape index: {}]   ;;  %s1562_s1 = inlined_call_operand.vmem [shape: f32[2,16,20], index: 1, kind: input, shape index: {}]   ;;  %s1563_s2 = inlined_call_operand.vmem [shape: f32[2,16,1], index: 2, kind: input, shape index: {}]   ;;  %s1564_s3 = inlined_call_operand.vmem [shape: f32[2,8,16], index: 3, kind: input, shape index: {}]   ;;  %s1565_s4 = inlined_call_operand.vmem [shape: f32[2,2,1], index: 4, kind: input, shape index: {}]   ;;  %s1566_s5 = inlined_call_operand.hbm [shape: f32[2,1,16], index: 5, kind: output, shape index: {0}]   ;;  %s1567_s6 = inlined_call_operand.hbm [shape: s32[2,1,16], index: 6, kind: output, shape index: {1}]   ;;  %s1568_s7 = inlined_call_operand.hbm [shape: f32[2,16,20], index: 7, kind: output, shape index: {2}]   ;;  %s1569_s8 = inlined_call_operand.hbm [shape: f32[2,8,16], index: 8, kind: output, shape index: {3}]  }
   0x1   :  { %1572 = sst [smem:[#allocation12_spill]] %s1561_s0 }
   0x2   :  { %1573 = sst [smem:[#allocation13_spill]] %s1562_s1 }
   0x3   :  { %1574 = sst [smem:[#allocation14_spill]] %s1563_s2 }
   0x4   :  { %1575 = sst [smem:[#allocation15_spill]] %s1564_s3 }
   0x5   :  { %14 = vsyncpa [#allocation3], 0 }
   0x6   :  { %16 = vsyncpa [#allocation3 + $0x1], 0 }
   0x7   :  { %17 = vsyncpa [#allocation5], 0 }
   0x8   :  { %19 = vsyncpa [#allocation5 + $0x1], 0 }
   0x9   :  { %20 = vsyncpa [#allocation8], 0 }
   0xa   :  { %22 = vsyncpa [#allocation8 + $0x1], 0  ;;  %s1259_s27 = smov 0   ;;  %s1261_s28 = smov 0  }
   0xb   :  { %s1263_s29 = smov 0   ;;  %s1265_s30 = smov 0  }
   0xc LB: > { %s1280_s9 = sadd.s32 4294967295, %s1208_s30   ;;  %s1570_s10 = sadd.s32 4294967294, %s1208_s30   ;;  %s1208_s30 = sphi %s1265_s30, %s1594_s30   ;;  %s1204_s29 = sphi %s1263_s29, %s1593_s29   ;;  %s1200_s28 = sphi %s1261_s28, %s1592_s28   ;;  %s1196_s27 = sphi %s1259_s27, %s1591_s27  }
   0xd   : > { %s1284_s11 = sadd.s32 1, %s1208_s30   ;;  %s165_s12 = sadd.s32 1, %s1204_s29 }
   0xe   : > { %s162_s13 = ssub.s32 %s1208_s30, %s1284_s11  ;;  %p175_p0 = scmp.ne.s32.totalorder %s1204_s29, %s1200_s28 }
   0xf   : > { %p163_p1 = scmp.eq.s32.totalorder %s162_s13, 0  ;;  %p176_p2 = scmp.eq.s32.totalorder %s1280_s9, 1 }
  0x10   : > { %p181_p3 = scmp.ne.s32.totalorder %s1200_s28, %s1196_s27  ;;  %p182_p4 = scmp.eq.s32.totalorder %s1570_s10, 1 }
  0x11   : > { %s1297_s14 = scalar_select %p163_p1, %s1204_s29, %s165_s12  }
  0x12   : > { %p1299_p5 = por %p176_p2, %p175_p0  ;;  %p1303_p6 = por %p182_p4, %p181_p3 }
  0x13   : > { %p932_p7 = scmp.ge.s32.totalorder %s1208_s30, 1  ;;  %p316_p8 = scmp.lt.s32.totalorder %s1208_s30, 3 }
  0x15   : > { %p317_p9 = pnand %p932_p7, %p316_p8 }
  0x16   : > { %p381_p10 = scmp.lt.s32.totalorder (!%p317_p9), %s1280_s9, 1  ;;  %s1578_s0 = sld [smem:[#allocation12_spill]] (!%p317_p9) }
  0x17   : > { %320 = sbr.rel (%p317_p9) target bundleno = 453 (0x1c5), region = 40  ;;  %s1579_s2 = sld [smem:[#allocation14_spill]] (!%p317_p9) }
  0x18   : > { %s1580_s1 = sld [smem:[#allocation13_spill]] (!%p317_p9)  ;;  %s687_s26 = scalar_lea.hbm (!%p317_p9), %s1566_s5, %s1280_s9 }
  0x19   : > { %s691_s19 = sshll.u32 (!%p317_p9), %s687_s26, 4  ;;  %s692_s19 = int_to_ptr.hbm [resolvable:$true] %s691_s19 }
  0x1c   : > { %s1311_s17 = scalar_select %p381_p10, %s1280_s9, 1  ;;  %vm425_vm0 = vcmask 89088   ;;  %vm406_vm1 = vcmask 97280   ;;  %v1210_v6 = vmov 0   ;;  %v468_v7 = vlaneseq }
  0x1d   : > { %1023 = vset.pattern.permute.xlu1 %v1210_v6  ;;  %1024 = vset.pattern.permute.xlu2 %v1210_v6 }
  0x1e   : > { %s1314_s18 = sshll.u32 %s1311_s17, 4  ;;  %1025 = vset.pattern.permute.xlu0 %v1210_v6  ;;  %v1332_v9 = vand.u32 127, %v468_v7  ;;  %s942_s13 = sshll.u32 %s1311_s17, 1 }
  0x1f   : > { %s385_s21 = scalar_lea.vmem %s1578_s0, %s1314_s18  ;;  %s1328_s24 = scalar_lea.vmem %s1579_s2, %s1314_s18 }
  0x20   : > { %v404_v0 = vld [vmem:[%s385_s21] sm:$0xff]  ;;  %v405_v3 = vld [vmem:[%s385_s21 + $0x8] sm:$0xff]  ;;  %s1359_s12 = scalar_lea.vmem %s1580_s1, %s1314_s18  ;;  %s403_s20 = scalar_lea.vmem %s1565_s4, %s942_s13 }
  0x21   : > { %v426_v1 = vsel %vm425_vm0, %v404_v0, -inf  ;;  %v407_v2 = vsel %vm406_vm1, %v404_v0, -inf  ;;  %v429_v4 = vsel %vm425_vm0, %v405_v3, -inf  ;;  %v410_v5 = vsel %vm406_vm1, %v405_v3, -inf  ;;  %v582_v8 = vld [vmem:[%s1328_s24] sm:$0xff]  ;;  %v583_v44 = vld [vmem:[%s1328_s24 + $0x8] sm:$0xff] }
  0x22   : > { %427 = vmax.xlane.f32.xlu0 %v426_v1  ;;  %408 = vmax.xlane.f32.xlu1 %v407_v2  ;;  %v947_v10 = vmul.f32 -1.442695, %v582_v8  ;;  %v948_v45 = vmul.f32 -1.442695, %v583_v44  ;;  %v542_v46 = vld [vmem:[%s1359_s12] sm:$0xff]  ;;  %s1420_s21 = sand.u32 1, %s1200_s28  }
  0x23   : > { %v945_v48 = vmul.f32 -1.442695, %v542_v46  ;;  %s933_s22 = sshll.u32 %s1420_s21, 4  ;;  %s360_s13 = scalar_lea.vmem [#allocation2], %s1420_s21 }
  0x24   : > { %1026 = vpow2.f32 %v947_v10  ;;  %s1427_s23 = scalar_lea.vmem [#allocation6], %s933_s22  ;;  %s689_s18 = sshll.u32 %s360_s13, 4  ;;  %s690_s18 = int_to_ptr.vmem [resolvable:$true] %s689_s18 }
  0x25   : > { %s1068_s22 = sshra.s32 %s692_s19, 4  ;;  %s1074_s0 = scalar_lea.hbm %s1566_s5, 2  ;;  %s1069_s22 = int_to_ptr.hbm [resolvable:$true] %s1068_s22 }
  0x26   : > { %s1070_s10 = scalar_lea.hbm %s1069_s22, 1  ;;  %p1075_p0 = scmp.lt.s32.totalorder %s1069_s22, %s1566_s5 }
  0x27   : > { %p1071_p11 = scmp.ne.s32.totalorder %s1069_s22, %s1070_s10  ;;  %p1076_p1 = scmp.lt.s32.totalorder %s1074_s0, %s1070_s10 }
  0x29   : > { %p1072_p12 = pnand %p1071_p11, %p1299_p5  ;;  %p1077_p2 = por %p1076_p1, %p1075_p0 }
  0x2a   : > { %430 = vmax.xlane.f32.xlu0 %v429_v4  ;;  %411 = vmax.xlane.f32.xlu1 %v410_v5  ;;  %v1027_v21 = vpop.eup %1026 }
  0x2b   : > { %v590_v27 = vadd.f32 1.0, %v1027_v21  ;;  %p1073_p13 = pneg %p1072_p12 }
  0x2d   : > { %vm597_vm4 = vweird.f32 %v590_v27  ;;  %v603_v38 = vand.u32 2147483648, %v590_v27  ;;  %v601_v40 = vand.u32 2147483647, %v590_v27  ;;  %p1078_p3 = pnand %p1077_p2, %p1073_p13 }
  0x2f   : > { %v604_v41 = vor.u32 1.1754944e-38, %v603_v38  ;;  %vm602_vm7 = vcmp.eq.f32.partialorder %v601_v40, 8.507059e+37 }
  0x95   : > { %v1334_v11 = vpop.xlane.xlu0 %427  ;;  %v1337_v12 = vpop.xlane.xlu1 %408 }
  0x96   : > { %vm470_vm2 = vcmp.eq.f32.partialorder %v404_v0, %v1334_v11  ;;  %v413_v14 = vsub.f32 %v404_v0, %v1337_v12  ;;  %v432_v15 = vsub.f32 %v1334_v11, %v1337_v12 }
  0x97   : > { %v472_v13 = vsel %vm470_vm2, %v1332_v9, 11 }
  0x98   : > { %v474_v16 = vsel %vm425_vm0, %v472_v13, 2147483647  ;;  %v415_v17 = vmul.f32 1.442695, %v413_v14  ;;  %v434_v5 = vmul.f32 1.442695, %v432_v15 }
  0x99   : > { %v476_v18 = vshra.s32 %v474_v16, 16  ;;  %v475_v50 = vand.u32 65535, %v474_v16 }
  0x9a   : > { %1028 = vpow2.f32 %v415_v17 }
  0x9b   : > { %v478_v19 = vcvt.s32.f32 %v476_v18  ;;  %v477_v53 = vcvt.s32.f32 %v475_v50 }
  0x9d   : > { %479 = vmin.xlane.f32.xlu2 %v478_v19  ;;  %v1344_v20 = vpop.xlane.xlu0 %430  ;;  %v1347_v22 = vpop.xlane.xlu1 %411 }
  0x9e   : > { %vm471_vm3 = vcmp.eq.f32.partialorder %v405_v3, %v1344_v20  ;;  %v414_v24 = vsub.f32 %v405_v3, %v1347_v22  ;;  %v433_v14 = vsub.f32 %v1344_v20, %v1347_v22 }
  0x9f   : > { %v473_v23 = vsel %vm471_vm3, %v1332_v9, 11 }
  0xa0   : > { %v489_v25 = vsel %vm425_vm0, %v473_v23, 2147483647  ;;  %v1029_v26 = vpop.eup %1028  ;;  %v417_v28 = vmul.f32 1.442695, %v414_v24  ;;  %v436_v23 = vmul.f32 1.442695, %v433_v14 }
  0xa1   : > { %v491_v29 = vshra.s32 %v489_v25, 16  ;;  %v419_v30 = vsel %vm406_vm1, %v1029_v26, 0.0  ;;  %v490_v57 = vand.u32 65535, %v489_v25  ;;  %v505_v26 = vshrl.u32 %v468_v7, 7 }
  0xa2   : > { %1030 = vpow2.f32 %v417_v28  ;;  %420 = vadd.xlane.f32.xlu0 %v419_v30 }
  0xa3   : > { %v493_v31 = vcvt.s32.f32 %v491_v29  ;;  %1032 = vrcp.f32 %v590_v27  ;;  %v492_v61 = vcvt.s32.f32 %v490_v57 }
  0xa4   : > { %1034 = vpow2.f32 %v948_v45  ;;  %v1211_v45 = vmov 0.0  }
  0xa5   : > { %494 = vmin.xlane.f32.xlu2 %v493_v31  ;;  %1036 = vpow2.f32 %v945_v48 }
  0xa8   : > { %v1031_v32 = vpop.eup %1030 }
  0xa9   : > { %v422_v33 = vsel %vm406_vm1, %v1031_v32, 0.0  ;;  %v1033_v34 = vpop.eup %1032 }
  0xaa   : > { %423 = vadd.xlane.f32.xlu1 %v422_v33  ;;  %v593_v35 = vmul.f32 %v1033_v34, %v590_v27  ;;  %vm598_vm5 = vweird.f32 %v1033_v34  ;;  %v1035_v47 = vpop.eup %1034 }
  0xab   : > { %vm599_vm6 = vmor %vm597_vm4, %vm598_vm5  ;;  %v591_v49 = vadd.f32 1.0, %v1035_v47  ;;  %v1037_v51 = vpop.eup %1036  ;;  %vm507_vm4 = vcmp.eq.s32.totalorder %v505_v26, %v1332_v9 }
  0xac   : > { %v594_v36 = vsub.f32 1.0, %v593_v35  ;;  %v1365_v56 = vadd.f32 1.0, %v1037_v51  ;;  %v1409_v46 = vsel %vm507_vm4, 1.0, %v1211_v45 }
  0xad   : > { %1038 = vrcp.f32 %v591_v49  ;;  %vm612_vm10 = vweird.f32 %v591_v49  ;;  %v616_v6 = vand.u32 2147483647, %v591_v49  ;;  %v618_v8 = vand.u32 2147483648, %v591_v49 }
  0xae   : > { %v595_v37 = vmul.f32 %v1033_v34, %v594_v36  ;;  %v561_v44 = vand.u32 2147483647, %v1365_v56 }
  0xaf   : > { %vm617_vm0 = vcmp.eq.f32.partialorder %v616_v6, 8.507059e+37 }
  0xb0   : > { %v596_v39 = vadd.f32 %v1033_v34, %v595_v37 }
  0xb2   : > { %v600_v42 = vsel %vm599_vm6, %v1033_v34, %v596_v39  ;;  %vm557_vm6 = vweird.f32 %v1365_v56  ;;  %v563_v39 = vand.u32 2147483648, %v1365_v56 }
  0xb3   : > { %v605_v43 = vsel %vm602_vm7, %v604_v41, %v600_v42  ;;  %v1039_v54 = vpop.eup %1038  ;;  %v643_v41 = vld [vmem:[%s403_s20] sm:$0x3]  ;;  %s665_s20 = scalar_lea.sflag [#allocation3], %s1420_s21 }
  0xb4   : > { %v608_v58 = vmul.f32 %v1039_v54, %v591_v49  ;;  %vm613_vm11 = vweird.f32 %v1039_v54  ;;  %v564_v51 = vor.u32 1.1754944e-38, %v563_v39 }
  0xb5   : > { %vm1378_vm14 = vmor %vm612_vm10, %vm613_vm11  ;;  %vm562_vm11 = vcmp.eq.f32.partialorder %v561_v44, 8.507059e+37 }
  0xb6   : > { %v609_v62 = vsub.f32 1.0, %v608_v58 }
  0xb8   : > { %v610_v0 = vmul.f32 %v1039_v54, %v609_v62 }
  0xba   : > { %v611_v13 = vadd.f32 %v1039_v54, %v610_v0 }
  0xbc   : > { %v615_v20 = vsel %vm1378_vm14, %v1039_v54, %v611_v13  ;;  %vm525_vm14 = vcmask 122880  }
  0xc3   : > { %624 = vperm.xlu1 %1023, %v605_v43  }
 0x110   : > { %v1362_v52 = vpop.xlane.xlu2 %479 }
 0x111   : > { %vm481_vm8 = vcmp.eq.f32.partialorder %v478_v19, %v1362_v52  ;;  %v619_v19 = vor.u32 1.1754944e-38, %v618_v8 }
 0x112   : > { %v482_v55 = vsel %vm481_vm8, %v477_v53, inf }
 0x113   : > { %483 = vmin.xlane.f32.xlu2 %v482_v55  ;;  %v620_v30 = vsel %vm617_vm0, %v619_v19, %v615_v20 }
 0x115   : > { %v421_v59 = vpop.xlane.xlu0 %420 }
 0x116   : > { %1040 = vrcp.f32 %v421_v59  ;;  %vm443_vm12 = vweird.f32 %v421_v59  ;;  %v449_v16 = vand.u32 2147483648, %v421_v59  ;;  %v447_v12 = vand.u32 2147483647, %v421_v59 }
 0x117   : > { %1042 = vrcp.f32 %v1365_v56 }
 0x118   : > { %v1368_v60 = vpop.xlane.xlu2 %494  ;;  %v450_v24 = vor.u32 1.1754944e-38, %v449_v16  ;;  %vm448_vm1 = vcmp.eq.f32.partialorder %v447_v12, 8.507059e+37 }
 0x119   : > { %vm496_vm9 = vcmp.eq.f32.partialorder %v493_v31, %v1368_v60  ;;  %v506_v31 = vadd.s32 8, %v505_v26 }
 0x11a   : > { %v497_v63 = vsel %vm496_vm9, %v492_v61, inf }
 0x11b   : > { %498 = vmin.xlane.f32.xlu0 %v497_v63  ;;  %vm508_vm9 = vcmp.eq.s32.totalorder %v506_v31, %v1332_v9 }
 0x11c   : > { %v1041_v1 = vpop.eup %1040  ;;  %v1413_v50 = vsel %vm508_vm9, 1.0, %v1211_v45 }
 0x11d   : > { %v1371_v2 = vpop.eup %1042  ;;  %v439_v3 = vmul.f32 %v1041_v1, %v421_v59  ;;  %v424_v4 = vpop.xlane.xlu1 %423  ;;  %vm444_vm13 = vweird.f32 %v1041_v1 }
 0x11e   : > { %1044 = vrcp.f32 %v424_v4  ;;  %v553_v18 = vmul.f32 %v1371_v2, %v1365_v56  ;;  %vm1384_vm15 = vmor %vm443_vm12, %vm444_vm13  ;;  %v464_v29 = vand.u32 2147483648, %v424_v4  ;;  %vm458_vm2 = vweird.f32 %v424_v4 }
 0x11f   : > { %v440_v10 = vsub.f32 1.0, %v439_v3  ;;  %1046 = vpow2.f32 %v434_v5  ;;  %v462_v33 = vand.u32 2147483647, %v424_v4  ;;  %vm558_vm7 = vweird.f32 %v1371_v2 }
 0x120   : > { %v554_v25 = vsub.f32 1.0, %v553_v18  ;;  %1048 = vpow2.f32 %v436_v23  ;;  %v465_v38 = vor.u32 1.1754944e-38, %v464_v29  ;;  %vm559_vm10 = vmor %vm557_vm6, %vm558_vm7  ;;  %vm515_vm12 = vcmask 130048  }
 0x121   : > { %v441_v11 = vmul.f32 %v1041_v1, %v440_v10  ;;  %vm463_vm8 = vcmp.eq.f32.partialorder %v462_v33, 8.507059e+37  ;;  %vm636_vm13 = vcmask 162816  }
 0x122   : > { %v555_v35 = vmul.f32 %v1371_v2, %v554_v25 }
 0x123   : > { %v442_v21 = vadd.f32 %v1041_v1, %v441_v11 }
 0x124   : > { %v1045_v22 = vpop.eup %1044  ;;  %v556_v43 = vadd.f32 %v1371_v2, %v555_v35 }
 0x125   : > { %v454_v27 = vmul.f32 %v1045_v22, %v424_v4  ;;  %v446_v28 = vsel %vm1384_vm15, %v1041_v1, %v442_v21  ;;  %vm459_vm3 = vweird.f32 %v1045_v22  ;;  %v1047_v7 = vpop.eup %1046 }
 0x126   : > { %v451_v34 = vsel %vm448_vm1, %v450_v24, %v446_v28  ;;  %vm1399_vm5 = vmor %vm458_vm2, %vm459_vm3  ;;  %v1049_v48 = vpop.eup %1048  ;;  %v560_v54 = vsel %vm559_vm10, %v1371_v2, %v556_v43 }
 0x127   : > { %v455_v32 = vsub.f32 1.0, %v454_v27  ;;  %v452_v40 = vmul.f32 %v1047_v7, %v451_v34  ;;  %v565_v56 = vsel %vm562_vm11, %v564_v51, %v560_v54 }
 0x129   : > { %v456_v36 = vmul.f32 %v1045_v22, %v455_v32  ;;  %v513_v9 = vmul.f32 %v1409_v46, %v452_v40 }
 0x12b   : > { %629 = vperm.xlu2 %1024, %v620_v30   ;;  %v457_v42 = vadd.f32 %v1045_v22, %v456_v36  ;;  %v516_v57 = vsel %vm515_vm12, %v513_v9, 0.0 }
 0x12d   : > { %v461_v47 = vsel %vm1399_vm5, %v1045_v22, %v457_v42 }
 0x12e   : > { %v466_v49 = vsel %vm463_vm8, %v465_v38, %v461_v47 }
 0x12f   : > { %648 = vperm.xlu0 %1025, %v643_v41   ;;  %v1416_v53 = vmul.f32 %v1049_v48, %v466_v49 }
 0x131   : > { %v514_v55 = vmul.f32 %v1413_v50, %v1416_v53 }
 0x133   : > { %v517_v58 = vsel %vm515_vm12, %v514_v55, 0.0 }
 0x134   : > { %v518_v59 = vadd.f32 %v517_v58, %v516_v57 }
 0x135   : > { %v625_v61 = vpop.permute.xlu1 %624 }
 0x136   : > { %v632_v62 = vmul.f32 %v625_v61, %v565_v56  ;;  %v519_v63 = vrot.slane %v518_v59, 4 }
 0x138   : > { %v634_v0 = vmul.f32 %v632_v62, %v452_v40  ;;  %v520_v1 = vadd.f32 %v519_v63, %v518_v59 }
 0x13a   : > { %637 = vst.msk [vmem:[%s1427_s23] sm:$0xff] %vm636_vm13, %v634_v0  ;;  %v521_v2 = vrot.slane %v520_v1, 2 }
 0x13c   : > { %v522_v3 = vadd.f32 %v521_v2, %v520_v1 }
 0x13e   : > { %v523_v4 = vrot.slane %v522_v3, 1 }
 0x140   : > { %v524_v5 = vadd.f32 %v523_v4, %v522_v3 }
 0x142   : > { %526 = vst.msk [vmem:[%s360_s13] sm:$0x1] %vm525_vm14, %v524_v5 }
 0x143   : > { %1081 = shalt.err (!%p1078_p3)
}
 0x144   : > { %965 = dma.vmem_to_hbm [thread:$0]  (%p1299_p5), %s690_s18, 16, %s692_s19, %s665_s20   ;;  %v543_v6 = vld [vmem:[%s1359_s12 + $0x8] sm:$0xff]  ;;  %v486_v12 = vcvt.f32.s32 %v1362_v52  ;;  %v501_v25 = vcvt.f32.s32 %v1368_v60  ;;  %vm652_vm3 = vcmask 123904  }
 0x145   : > { %v946_v8 = vmul.f32 -1.442695, %v543_v6  ;;  %s941_s0 = sshll.u32 %s1311_s17, 3  ;;  %s1587_s3 = sld [smem:[#allocation15_spill]] }
 0x146   : > { %v487_v23 = vshll.u32 %v486_v12, 16  ;;  %v502_v30 = vshll.u32 %v501_v25, 16  ;;  %s934_s17 = sshll.u32 %s1420_s21, 3  ;;  %s953_s13 = sshll.u32 %s1280_s9, 3 }
 0x147   : > { %1050 = vpow2.f32 %v946_v8  ;;  %s716_s18 = sshll.u32 %s1427_s23, 4  ;;  %s731_s22 = scalar_lea.hbm %s1569_s8, %s953_s13  ;;  %s1468_s18 = int_to_ptr.vmem [resolvable:$true] %s716_s18 }
 0x148   : > { %s959_s25 = sshll.u32 %s1280_s9, 4  ;;  %s1571_s13 = scalar_lea.vmem [#allocation4], %s1420_s21 }
 0x149   : > { %s1479_s19 = sshll.u32 %s1571_s13, 4  ;;  %s678_s24 = scalar_lea.sflag [#allocation8], %s1420_s21  ;;  %s703_s19 = int_to_ptr.vmem [resolvable:$true] %s1479_s19 }
 0x14a   : > { %s1102_s2 = scalar_lea.hbm %s1569_s8, 16 }
 0x14b   : > { %s399_s12 = scalar_lea.vmem %s1587_s3, %s941_s0  ;;  %s735_s0 = sshll.u32 %s731_s22, 4  ;;  %s736_s0 = int_to_ptr.hbm [resolvable:$true] %s735_s0 }
 0x14c   : > { %v640_v38 = vld [vmem:[%s399_s12 + $0x2] sm:$0x3]  ;;  %v642_v39 = vld [vmem:[%s399_s12 + $0x6] sm:$0x3]  ;;  %v639_v44 = vld [vmem:[%s399_s12] sm:$0x3] }
 0x14d   : > { %v1051_v10 = vpop.eup %1050  ;;  %v644_v42 = vmul.f32 0.5, %v640_v38  ;;  %v657_v43 = vmul.f32 0.5, %v642_v39  ;;  %v641_v45 = vld [vmem:[%s399_s12 + $0x4] sm:$0x3]  ;;  %s700_s12 = scalar_lea.hbm %s1567_s6, %s1280_s9 }
 0x14e   : > { %v551_v13 = vadd.f32 1.0, %v1051_v10  ;;  %s1489_s22 = sshll.u32 %s700_s12, 4  ;;  %s705_s22 = int_to_ptr.hbm [resolvable:$true] %s1489_s22 }
 0x14f   : > { %v645_v48 = vsub.f32 %v639_v44, %v644_v42  ;;  %v654_v49 = vadd.f32 %v644_v42, %v639_v44  ;;  %v661_v51 = vadd.f32 %v657_v43, %v641_v45 }
 0x150   : > { %1052 = vrcp.f32 %v551_v13  ;;  %vm572_vm15 = vweird.f32 %v551_v13  ;;  %v578_v11 = vand.u32 2147483648, %v551_v13  ;;  %v576_v19 = vand.u32 2147483647, %v551_v13 }
 0x152   : > { %v579_v22 = vor.u32 1.1754944e-38, %v578_v11  ;;  %vm577_vm2 = vcmp.eq.f32.partialorder %v576_v19, 8.507059e+37 }
 0x156   : > { %v1053_v14 = vpop.eup %1052 }
 0x157   : > { %v568_v16 = vmul.f32 %v1053_v14, %v551_v13  ;;  %vm573_vm0 = vweird.f32 %v1053_v14 }
 0x158   : > { %vm574_vm1 = vmor %vm572_vm15, %vm573_vm0 }
 0x159   : > { %v569_v17 = vsub.f32 1.0, %v568_v16 }
 0x15b   : > { %v570_v18 = vmul.f32 %v1053_v14, %v569_v17 }
 0x15d   : > { %v571_v15 = vadd.f32 %v1053_v14, %v570_v18 }
 0x15f   : > { %v575_v24 = vsel %vm574_vm1, %v1053_v14, %v571_v15 }
 0x160   : > { %v580_v27 = vsel %vm577_vm2, %v579_v22, %v575_v24 }
 0x186   : > { %v484_v20 = vpop.xlane.xlu2 %483 }
 0x187   : > { %v485_v21 = vcvt.f32.s32 %v484_v20 }
 0x189   : > { %v488_v26 = vadd.s32 %v487_v23, %v485_v21 }
 0x18b   : > { %v527_v31 = vcvt.s32.f32 %v488_v26 }
 0x18d   : > { %v529_v35 = vmul.f32 %v1409_v46, %v527_v31 }
 0x18e   : > { %v630_v28 = vpop.permute.xlu2 %629  ;;  %v499_v29 = vpop.xlane.xlu0 %498 }
 0x18f   : > { %v633_v52 = vmul.f32 %v630_v28, %v580_v27  ;;  %v500_v32 = vcvt.f32.s32 %v499_v29  ;;  %v531_v36 = vsel %vm515_vm12, %v529_v35, 0.0 }
 0x191   : > { %v635_v33 = vmul.f32 %v633_v52, %v1416_v53  ;;  %v503_v34 = vadd.s32 %v502_v30, %v500_v32 }
 0x193   : > { %638 = vst.msk [vmem:[%s1427_s23 + $0x8] sm:$0xff] %vm636_vm13, %v635_v33  ;;  %v528_v7 = vcvt.s32.f32 %v503_v34  ;;  %s380_s23 = scalar_lea.vmem [#allocation7], %s934_s17  ;;  %s1485_s17 = scalar_lea.hbm %s1568_s7, %s959_s25 }
 0x194   : > { %s733_s26 = sshll.u32 %s380_s23, 4  ;;  %s718_s1 = sshll.u32 %s1485_s17, 4  ;;  %s734_s26 = int_to_ptr.vmem [resolvable:$true] %s733_s26  ;;  %s1506_s1 = int_to_ptr.hbm [resolvable:$true] %s718_s1 }
 0x195   : > { %v530_v60 = vmul.f32 %v1413_v50, %v528_v7  ;;  %v658_v50 = vsub.f32 %v641_v45, %v657_v43  ;;  %s1096_s25 = sshra.s32 %s736_s0, 4  ;;  %s1097_s25 = int_to_ptr.hbm [resolvable:$true] %s1096_s25 }
 0x196   : > { %s1098_s10 = scalar_lea.hbm %s1097_s25, 8  ;;  %p1103_p9 = scmp.lt.s32.totalorder %s1097_s25, %s1569_s8 }
 0x197   : > { %v532_v37 = vsel %vm515_vm12, %v530_v60, 0.0  ;;  %p1099_p4 = scmp.ne.s32.totalorder %s1097_s25, %s1098_s10  ;;  %p1104_p10 = scmp.lt.s32.totalorder %s1102_s2, %s1098_s10 }
 0x198   : > { %v533_v40 = vadd.f32 %v532_v37, %v531_v36 }
 0x199   : > { %p1100_p7 = pnand %p1099_p4, %p1299_p5  ;;  %p1105_p11 = por %p1104_p10, %p1103_p9 }
 0x19a   : > { %v534_v41 = vrot.slane %v533_v40, 4 }
 0x19b   : > { %p1101_p8 = pneg %p1100_p7 }
 0x19c   : > { %v535_v46 = vadd.f32 %v534_v41, %v533_v40 }
 0x19d   : > { %p1106_p12 = pnand %p1105_p11, %p1101_p8 }
 0x19e   : > { %v536_v47 = vrot.slane %v535_v46, 2 }
 0x1a0   : > { %v537_v9 = vadd.f32 %v536_v47, %v535_v46 }
 0x1a1   : > { %v649_v53 = vpop.permute.xlu0 %648 }
 0x1a2   : > { %v538_v54 = vrot.slane %v537_v9, 1  ;;  %v651_v55 = vmul.f32 %v649_v53, %v645_v48  ;;  %v655_v56 = vmul.f32 %v654_v49, %v649_v53  ;;  %v659_v57 = vmul.f32 %v658_v50, %v649_v53 }
 0x1a3   : > { %v662_v58 = vmul.f32 %v661_v51, %v649_v53 }
 0x1a4   : > { %v539_v59 = vadd.f32 %v538_v54, %v537_v9  ;;  %653 = vst.msk [vmem:[%s380_s23] sm:$0x3] %vm652_vm3, %v651_v55 }
 0x1a5   : > { %656 = vst.msk [vmem:[%s380_s23 + $0x2] sm:$0x3] %vm652_vm3, %v655_v56 }
 0x1a6   : > { %660 = vst.msk [vmem:[%s380_s23 + $0x4] sm:$0x3] %vm652_vm3, %v659_v57  ;;  %vm960_vm4 = vcmp.lt.s32.totalorder %v539_v59, 0  ;;  %v961_v61 = vceil.f32 %v539_v59  ;;  %v962_v62 = vfloor.f32 %v539_v59 }
 0x1a7   : > { %663 = vst.msk [vmem:[%s380_s23 + $0x6] sm:$0x3] %vm652_vm3, %v662_v58 }
 0x1a8   : > { %v963_v63 = vsel %vm960_vm4, %v961_v61, %v962_v62 }
 0x1a9   : > { %1109 = shalt.err (!%p1106_p12)
}
 0x1aa   : > { %968 = dma.vmem_to_hbm [thread:$0]  (%p1299_p5), %s734_s26, 128, %s736_s0, %s678_s24   ;;  %v964_v0 = vcvt.f32.s32 %v963_v63 }
 0x1ab   : > { %s1588_s23 = scalar_lea.vmem [#allocation4], %s1420_s21  ;;  %s1589_s3 = sand.u32 1, %s1280_s9  }
 0x1ac   : > { %541 = vst.msk [vmem:[%s1588_s23] sm:$0x1] %vm525_vm14, %v964_v0  ;;  %s1513_s13 = scalar_lea.sflag [#allocation5], %s1589_s3  ;;  %s1124_s2 = sshra.s32 %s705_s22, 4  ;;  %s1125_s2 = int_to_ptr.hbm [resolvable:$true] %s1124_s2 }
 0x1ad   : > { %s1126_s17 = scalar_lea.hbm %s1125_s2, 1  ;;  %s1130_s26 = scalar_lea.hbm %s1567_s6, 2 }
 0x1ae   : > { %p1127_p13 = scmp.ne.s32.totalorder %s1125_s2, %s1126_s17  ;;  %p1131_p2 = scmp.lt.s32.totalorder %s1125_s2, %s1567_s6 }
 0x1af   : > { %p1132_p3 = scmp.lt.s32.totalorder %s1130_s26, %s1126_s17 }
 0x1b0   : > { %p1128_p0 = pnand %p1127_p13, %p1299_p5 }
 0x1b1   : > { %p1133_p4 = por %p1132_p3, %p1131_p2 }
 0x1b2   : > { %p1129_p1 = pneg %p1128_p0 }
 0x1b4   : > { %p1134_p7 = pnand %p1133_p4, %p1129_p1 }
 0x1b6   : > { %1137 = shalt.err (!%p1134_p7)
}
 0x1b7   : > { %966 = dma.vmem_to_hbm [thread:$0]  (%p1299_p5), %s703_s19, 16, %s705_s22, %s1513_s13  }
 0x1b8   : > { %s1152_s9 = sshra.s32 %s1506_s1, 4  ;;  %s1158_s23 = scalar_lea.hbm %s1568_s7, 32  ;;  %s1153_s9 = int_to_ptr.hbm [resolvable:$true] %s1152_s9 }
 0x1b9   : > { %s1154_s21 = scalar_lea.hbm %s1153_s9, 16  ;;  %p1159_p11 = scmp.lt.s32.totalorder %s1153_s9, %s1568_s7 }
 0x1ba   : > { %p1155_p8 = scmp.ne.s32.totalorder %s1153_s9, %s1154_s21  ;;  %p1160_p12 = scmp.lt.s32.totalorder %s1158_s23, %s1154_s21 }
 0x1bc   : > { %p1156_p9 = pnand %p1155_p8, %p1299_p5  ;;  %p1161_p13 = por %p1160_p12, %p1159_p11 }
 0x1be   : > { %p1157_p10 = pneg %p1156_p9 }
 0x1c0   : > { %p1162_p0 = pnand %p1161_p13, %p1157_p10 }
 0x1c2   : > { %1165 = shalt.err (!%p1162_p0)
}
 0x1c3   : > { %s1212_s19 = smov 128   ;;  %s1213_s22 = smov 8  }
 0x1c4   : > { %967 = dma.vmem_to_hbm [thread:$0]  (%p1299_p5), %s1468_s18, 256, %s1506_s1, %s1513_s13, %s1212_s19, %s1212_s19, %s1213_s22  }
 0x1c5 PF: > { %p986_p1 = scmp.ge.s32.totalorder %s1208_s30, 2  ;;  %s747_s17 = sand.u32 1, %s1196_s27  }
 0x1c6   : > { %s748_s25 = scalar_lea.sflag [#allocation3], %s747_s17 }
 0x1c7   : > { %p974_p2 = pnand %p986_p1, %p1303_p6 }
 0x1c9   : > { %p975_p3 = pneg %p974_p2 }
 0x1cb   : > { %1183 = dma.done.wait (%p975_p3), %s748_s25, 16  }
 0x1cc   : > { %1185 = vsyncadd (%p975_p3), %s748_s25, 4294967280  ;;  %s1590_s10 = sadd.s32 4294967294, %s1208_s30  }
 0x1cd   : > { %s756_s26 = sand.u32 1, %s1590_s10  }
 0x1ce   : > { %s757_s0 = scalar_lea.sflag [#allocation5], %s756_s26 }
 0x1cf   : > { %1187 = dma.done.wait (%p975_p3), %s757_s0, 272  }
 0x1d0   : > { %1189 = vsyncadd (%p975_p3), %s757_s0, 4294967024  ;;  %s776_s15 = scalar_lea.sflag [#allocation8], %s747_s17 }
 0x1d1   : > { %1191 = dma.done.wait (%p975_p3), %s776_s15, 128  }
 0x1d2   : > { %1193 = vsyncadd (%p975_p3), %s776_s15, 4294967168  ;;  %p25_p5 = scmp.ge.s32.totalorder %s1284_s11, 4   ;;  %s1591_s27 = smov %s1200_s28 }
 0x1d3   : > { %s1592_s28 = smov %s1204_s29  ;;  %s1593_s29 = smov %s1297_s14 }
 0x1d4   : > { %s1594_s30 = smov %s1284_s11  ;;  %27 = sbr.rel (!%p25_p5) target bundleno = 12 (0xc), region = 136 }
 0x1d9   :  { %782 = vsyncpa [#allocation3], 1 }
 0x1da   :  { %784 = vsyncpa [#allocation3 + $0x1], 1 }
 0x1db   :  { %785 = vsyncpa [#allocation5], 1 }
 0x1dc   :  { %787 = vsyncpa [#allocation5 + $0x1], 1 }
 0x1dd   :  { %788 = vsyncpa [#allocation8], 1 }
 0x1de   :  { %790 = vsyncpa [#allocation8 + $0x1], 1 }

</bundles_post_ra>
